<compile_context>
chip_gen: v7x
topology: tpu7x:2x2x1
jax: 0.10.0
libtpu: 0.0.40
codegen_flags: <defaults>
</compile_context>

<pallas_src>
import functools

import jax
import jax.numpy as jnp
from jax import lax
from jax.experimental import pallas as pl
from jax.experimental.pallas import tpu as pltpu

EPS = 1e-5
LEAK = 0.2


def _dfixed_layer2_kernel(patches_ref, wb_ref, w1y_ref, params_ref, *rest,
                          hw, has_prev, compute_dtype):
    """One batch sample per grid step.

    patches_ref : (1, K1, HW)    im2col slab of the padded input (K1 = Cin*k*k)
    wb_ref      : (Cout, K1)     branch conv weight, reshaped
    w1y_ref     : (Cout, Cb)     1x1-conv columns acting on the branch output
    params_ref  : (4, Cout, 1)   rows = [in1_gamma, in1_beta, in2_gamma, in2_beta]
    prev_ref    : (1, Cprev, HW) [only if has_prev] selected skip inputs, channel-stacked
    w1p_ref     : (Cout, Cprev)  [only if has_prev] 1x1-conv columns acting on the skips
    out_ref     : (1, Cout, HW)
    """
    if has_prev:
        prev_ref, w1p_ref, out_ref = rest
    else:
        (out_ref,) = rest

    inv_hw = 1.0 / hw
    g1 = params_ref[0]                                          # (Cout, 1) f32
    b1 = params_ref[1]
    g2 = params_ref[2]
    b2 = params_ref[3]

    # ---- branch conv: single im2col matmul on the MXU, f32 accumulation ----
    acc = jnp.dot(wb_ref[...], patches_ref[0],
                  preferred_element_type=jnp.float32)           # (Cout, HW)

    # ---- InstanceNorm2d #1 (affine): fused single-pass stats -> scale/shift ----
    mu = jnp.sum(acc, axis=-1, keepdims=True) * inv_hw          # (Cout, 1)
    ex2 = jnp.sum(acc * acc, axis=-1, keepdims=True) * inv_hw
    var = ex2 - mu * mu
    scale = g1 * lax.rsqrt(var + EPS)
    shift = b1 - mu * scale
    y = acc * scale + shift
    y = jnp.maximum(y, LEAK * y)                                # LeakyReLU(0.2)

    # ---- dim_reduc 1x1 conv over [skips ; y]: split matmul, no concat copy ----
    z = jnp.dot(w1y_ref[...], y.astype(compute_dtype),
                preferred_element_type=jnp.float32)             # (Cout, HW)
    if has_prev:
        z = z + jnp.dot(w1p_ref[...], prev_ref[0],
                        preferred_element_type=jnp.float32)
    z = jnp.maximum(z, LEAK * z)                                # LeakyReLU(0.2)

    # ---- InstanceNorm2d #2 (affine) ----
    mu2 = jnp.sum(z, axis=-1, keepdims=True) * inv_hw
    ex2b = jnp.sum(z * z, axis=-1, keepdims=True) * inv_hw
    var2 = ex2b - mu2 * mu2
    scale2 = g2 * lax.rsqrt(var2 + EPS)
    shift2 = b2 - mu2 * scale2
    out_ref[0] = (z * scale2 + shift2).astype(out_ref.dtype)


def dfixed_layer2_forward(x, prev_layers, sample_arc, params, layer_id,
                          *, compute_dtype=jnp.float32):
    """JAX/Pallas equivalent of DFixedLayer2.forward (NCHW in / NCHW out)."""
    layer_type = int(sample_arc[0])
    skip_indices = [int(s) for s in sample_arc[1]] if layer_id > 0 else []

    if layer_type == 0:
        w, g1, b1 = params["w3"], params["in3_g"], params["in3_b"]
    elif layer_type == 1:
        w, g1, b1 = params["w5"], params["in5_g"], params["in5_b"]
    else:
        raise ValueError("Unknown layer_type {}".format(layer_type))
    # NOTE: the branch Conv2d bias (params["cb3"/"cb5"]) is intentionally not used:
    # a per-channel constant added right before InstanceNorm cancels in (x - mean).

    Cout, Cin, k, _ = w.shape
    p = (k - 1) // 2
    N, _, H, W = x.shape
    HW = H * W
    K1 = Cin * k * k

    # im2col slab (channel-major taps so the weight reshape is a plain .reshape).
    xpad = jnp.pad(x.astype(jnp.float32), ((0, 0), (0, 0), (p, p), (p, p)))
    taps = [xpad[:, :, dy:dy + H, dx:dx + W] for dy in range(k) for dx in range(k)]
    patches = (jnp.stack(taps, axis=2)                   # (N, Cin, k*k, H, W)
               .reshape(N, K1, HW).astype(compute_dtype))
    wb = w.reshape(Cout, K1).astype(compute_dtype)

    # 1x1 dim-reduction conv, split by channel group (concat order: skips first, branch last).
    w1 = params["w1x1"].reshape(params["w1x1"].shape[0], -1)    # (Cout, C_total)
    selected = [prev for prev, s in zip(prev_layers, skip_indices) if s == 1]
    c_prev = sum(int(prev.shape[1]) for prev in selected)
    w1_prev = w1[:, :c_prev].astype(compute_dtype)
    w1_y = w1[:, c_prev:].astype(compute_dtype)

    params_packed = (jnp.stack([g1, b1, params["in_f_g"], params["in_f_b"]], axis=0)
                     .astype(jnp.float32).reshape(4, Cout, 1))

    inputs = [patches, wb, w1_y, params_packed]
    in_specs = [
        pl.BlockSpec((1, K1, HW), lambda n: (n, 0, 0)),
        pl.BlockSpec((Cout, K1), lambda n: (0, 0)),
        pl.BlockSpec((Cout, w1_y.shape[1]), lambda n: (0, 0)),
        pl.BlockSpec((4, Cout, 1), lambda n: (0, 0, 0)),
    ]
    has_prev = c_prev > 0
    if has_prev:
        prev_slab = jnp.concatenate(
            [prev.reshape(N, -1, HW) for prev in selected], axis=1).astype(compute_dtype)
        inputs += [prev_slab, w1_prev]
        in_specs += [
            pl.BlockSpec((1, c_prev, HW), lambda n: (n, 0, 0)),
            pl.BlockSpec((Cout, c_prev), lambda n: (0, 0)),
        ]

    kern = functools.partial(_dfixed_layer2_kernel, hw=float(HW),
                             has_prev=has_prev, compute_dtype=compute_dtype)

    out = pl.pallas_call(
        kern,
        grid=(N,),
        in_specs=in_specs,
        out_specs=pl.BlockSpec((1, Cout, HW), lambda n: (n, 0, 0)),
        out_shape=jax.ShapeDtypeStruct((N, Cout, HW), jnp.float32),
        compiler_params=pltpu.CompilerParams(
            dimension_semantics=("parallel",),
            vmem_limit_bytes=32 * 1024 * 1024),
    )(*inputs)

    return out.reshape(N, Cout, H, W)        # already NCHW, no transpose needed


def _ref_forward(x, prev_layers, sample_arc, params, layer_id):
    """Pure-JAX reference mirroring PyTorch DFixedLayer2.forward exactly
    (includes the branch Conv2d bias, which cancels inside InstanceNorm)."""
    layer_type = int(sample_arc[0])
    skips = [int(s) for s in sample_arc[1]] if layer_id > 0 else []
    if layer_type == 0:
        w, cb, g1, b1 = params["w3"], params["cb3"], params["in3_g"], params["in3_b"]
    else:
        w, cb, g1, b1 = params["w5"], params["cb5"], params["in5_g"], params["in5_b"]
    k = w.shape[-1]
    p = (k - 1) // 2

    def inorm(t, g, b):
        mu = jnp.mean(t, axis=(2, 3), keepdims=True)
        var = jnp.mean((t - mu) ** 2, axis=(2, 3), keepdims=True)
        return ((t - mu) * lax.rsqrt(var + EPS) * g.reshape(1, -1, 1, 1)
                + b.reshape(1, -1, 1, 1))

    def lrelu(t):
        return jnp.maximum(t, LEAK * t)

    conv = lax.conv_general_dilated(
        x, w, (1, 1), [(p, p), (p, p)],
        dimension_numbers=("NCHW", "OIHW", "NCHW"),
        precision=lax.Precision.HIGHEST) + cb.reshape(1, -1, 1, 1)
    y = lrelu(inorm(conv, g1, b1))

    res = [prev for prev, s in zip(prev_layers, skips) if s == 1]
    cat = jnp.concatenate(res + [y], axis=1)
    z = lax.conv_general_dilated(
        cat, params["w1x1"], (1, 1), [(0, 0), (0, 0)],
        dimension_numbers=("NCHW", "OIHW", "NCHW"),
        precision=lax.Precision.HIGHEST)
    return inorm(lrelu(z), params["in_f_g"], params["in_f_b"])


if __name__ == "__main__":
    key = jax.random.PRNGKey(0)
    N, C, H, W = 2, 8, 16, 16          # in_planes == out_planes (module's concat assumption)
    ks = jax.random.split(key, 16)

    x = jax.random.normal(ks[0], (N, C, H, W), jnp.float32)
    prev_layers = [
        jax.random.normal(ks[1], (N, C, H, W), jnp.float32),
        jax.random.normal(ks[2], (N, C, H, W), jnp.float32),
    ]

    base = {
        # branch 0: Conv2d(C, C, 3, padding=1) + InstanceNorm2d(affine)
        "w3": 0.1 * jax.random.normal(ks[3], (C, C, 3, 3), jnp.float32),
        "cb3": 0.1 * jax.random.normal(ks[4], (C,), jnp.float32),
        "in3_g": 1.0 + 0.1 * jax.random.normal(ks[5], (C,), jnp.float32),
        "in3_b": 0.1 * jax.random.normal(ks[6], (C,), jnp.float32),
        # branch 1: Conv2d(C, C, 5, padding=2) + InstanceNorm2d(affine)
        "w5": 0.1 * jax.random.normal(ks[7], (C, C, 5, 5), jnp.float32),
        "cb5": 0.1 * jax.random.normal(ks[8], (C,), jnp.float32),
        "in5_g": 1.0 + 0.1 * jax.random.normal(ks[9], (C,), jnp.float32),
        "in5_b": 0.1 * jax.random.normal(ks[10], (C,), jnp.float32),
        # final InstanceNorm2d(affine) after the 1x1 dim reduction
        "in_f_g": 1.0 + 0.1 * jax.random.normal(ks[11], (C,), jnp.float32),
        "in_f_b": 0.1 * jax.random.normal(ks[12], (C,), jnp.float32),
    }

    # --- config A: layer_id > 0, 5x5 branch, one active skip (prev[0]) ---
    sample_arc_a = (1, [1, 0])
    params_a = dict(base, w1x1=0.2 * jax.random.normal(ks[13], (C, 2 * C, 1, 1), jnp.float32))
    out_a = jax.block_until_ready(
        dfixed_layer2_forward(x, prev_layers, sample_arc_a, params_a, layer_id=2))
    ref_a = _ref_forward(x, prev_layers, sample_arc_a, params_a, layer_id=2)
    assert out_a.shape == (N, C, H, W)
    assert jnp.allclose(out_a, ref_a, atol=1e-3, rtol=1e-3), "config A (f32) mismatch"

    # same config, bf16 MXU feed (f32 accumulation + f32 norm math)
    out_a16 = jax.block_until_ready(
        dfixed_layer2_forward(x, prev_layers, sample_arc_a, params_a, layer_id=2,
                              compute_dtype=jnp.bfloat16))
    assert jnp.allclose(out_a16, ref_a, atol=3e-2, rtol=3e-2), "config A (bf16) mismatch"

    # --- config B: layer_id == 0, 3x3 branch, no skips (no prev inputs passed) ---
    sample_arc_b = (0, [])
    params_b = dict(base, w1x1=0.2 * jax.random.normal(ks[14], (C, C, 1, 1), jnp.float32))
    out_b = jax.block_until_ready(
        dfixed_layer2_forward(x, [], sample_arc_b, params_b, layer_id=0))
    ref_b = _ref_forward(x, [], sample_arc_b, params_b, layer_id=0)
    assert out_b.shape == (N, C, H, W)
    assert jnp.allclose(out_b, ref_b, atol=1e-3, rtol=1e-3), "config B (f32) mismatch"

    print("KERNEL_OK")
</pallas_src>

<mosaic_0001>
module attributes {stable_mosaic.version = 11 : i64} {
  func.func @_dfixed_layer2_kernel(%arg0: i32, %arg1: memref<1x200x256xf32, #tpu.memory_space<vmem>>, %arg2: memref<8x200xf32, #tpu.memory_space<vmem>>, %arg3: memref<8x8xf32, #tpu.memory_space<vmem>>, %arg4: memref<4x8x1xf32, #tpu.memory_space<vmem>>, %arg5: memref<1x8x256xf32, #tpu.memory_space<vmem>>, %arg6: memref<8x8xf32, #tpu.memory_space<vmem>>, %arg7: memref<1x8x256xf32, #tpu.memory_space<vmem>>) attributes {dimension_semantics = [#tpu.dimension_semantics<parallel>], iteration_bounds = array<i64: 2>, scalar_prefetch = 0 : i64, scratch_operands = 0 : i64, tpu.core_type = #tpu.core_type<tc>, window_params = [{transform_indices = @transform_0, window_bounds = array<i64: 1, 200, 256>}, {pipeline_mode = #tpu.pipeline_mode<synchronous>, transform_indices = @transform_1, window_bounds = array<i64: 8, 200>}, {pipeline_mode = #tpu.pipeline_mode<synchronous>, transform_indices = @transform_2, window_bounds = array<i64: 8, 8>}, {pipeline_mode = #tpu.pipeline_mode<synchronous>, transform_indices = @transform_3, window_bounds = array<i64: 4, 8, 1>}, {transform_indices = @transform_4, window_bounds = array<i64: 1, 8, 256>}, {pipeline_mode = #tpu.pipeline_mode<synchronous>, transform_indices = @transform_5, window_bounds = array<i64: 8, 8>}, {transform_indices = @transform_6, window_bounds = array<i64: 1, 8, 256>}]} {
    %c0 = arith.constant 0 : index
    %c0_0 = arith.constant 0 : index
    %c0_1 = arith.constant 0 : index
    %0 = vector.load %arg4[%c0, %c0_0, %c0_1] : memref<4x8x1xf32, #tpu.memory_space<vmem>>, vector<1x8x1xf32>
    %1 = vector.shape_cast %0 : vector<1x8x1xf32> to vector<8x1xf32>
    %c1 = arith.constant 1 : index
    %c0_2 = arith.constant 0 : index
    %c0_3 = arith.constant 0 : index
    %2 = vector.load %arg4[%c1, %c0_2, %c0_3] : memref<4x8x1xf32, #tpu.memory_space<vmem>>, vector<1x8x1xf32>
    %3 = vector.shape_cast %2 : vector<1x8x1xf32> to vector<8x1xf32>
    %c2 = arith.constant 2 : index
    %c0_4 = arith.constant 0 : index
    %c0_5 = arith.constant 0 : index
    %4 = vector.load %arg4[%c2, %c0_4, %c0_5] : memref<4x8x1xf32, #tpu.memory_space<vmem>>, vector<1x8x1xf32>
    %5 = vector.shape_cast %4 : vector<1x8x1xf32> to vector<8x1xf32>
    %c3 = arith.constant 3 : index
    %c0_6 = arith.constant 0 : index
    %c0_7 = arith.constant 0 : index
    %6 = vector.load %arg4[%c3, %c0_6, %c0_7] : memref<4x8x1xf32, #tpu.memory_space<vmem>>, vector<1x8x1xf32>
    %7 = vector.shape_cast %6 : vector<1x8x1xf32> to vector<8x1xf32>
    %c0_8 = arith.constant 0 : index
    %c0_9 = arith.constant 0 : index
    %8 = vector.load %arg2[%c0_8, %c0_9] : memref<8x200xf32, #tpu.memory_space<vmem>>, vector<8x200xf32>
    %c0_10 = arith.constant 0 : index
    %c0_11 = arith.constant 0 : index
    %c0_12 = arith.constant 0 : index
    %9 = vector.load %arg1[%c0_10, %c0_11, %c0_12] : memref<1x200x256xf32, #tpu.memory_space<vmem>>, vector<1x200x256xf32>
    %10 = vector.shape_cast %9 : vector<1x200x256xf32> to vector<200x256xf32>
    %cst = arith.constant dense<0.000000e+00> : vector<8x256xf32>
    %11 = tpu.matmul %8, %10, %cst {dimension_numbers = #tpu.dot_dimension_numbers<[1], [0], [0], [1], [0, 0, 1, 1], [], []>} : vector<8x200xf32>, vector<200x256xf32>, vector<8x256xf32> -> vector<8x256xf32>
    %cst_13 = arith.constant dense<0.000000e+00> : vector<8xf32>
    %12 = vector.multi_reduction <add>, %11, %cst_13 [1] : vector<8x256xf32> to vector<8xf32>
    %13 = vector.shape_cast %12 : vector<8xf32> to vector<8x1xf32>
    %cst_14 = arith.constant 3.906250e-03 : f32
    %14 = vector.broadcast %cst_14 : f32 to vector<8x1xf32>
    %15 = arith.mulf %13, %14 : vector<8x1xf32>
    %16 = arith.mulf %11, %11 : vector<8x256xf32>
    %cst_15 = arith.constant dense<0.000000e+00> : vector<8xf32>
    %17 = vector.multi_reduction <add>, %16, %cst_15 [1] : vector<8x256xf32> to vector<8xf32>
    %18 = vector.shape_cast %17 : vector<8xf32> to vector<8x1xf32>
    %cst_16 = arith.constant 3.906250e-03 : f32
    %19 = vector.broadcast %cst_16 : f32 to vector<8x1xf32>
    %20 = arith.mulf %18, %19 : vector<8x1xf32>
    %21 = arith.mulf %15, %15 : vector<8x1xf32>
    %22 = arith.subf %20, %21 : vector<8x1xf32>
    %cst_17 = arith.constant 9.99999974E-6 : f32
    %23 = vector.broadcast %cst_17 : f32 to vector<8x1xf32>
    %24 = arith.addf %22, %23 : vector<8x1xf32>
    %25 = math.rsqrt %24 : vector<8x1xf32>
    %26 = arith.mulf %1, %25 : vector<8x1xf32>
    %27 = arith.mulf %15, %26 : vector<8x1xf32>
    %28 = arith.subf %3, %27 : vector<8x1xf32>
    %29 = vector.broadcast %26 : vector<8x1xf32> to vector<8x256xf32>
    %30 = arith.mulf %11, %29 : vector<8x256xf32>
    %31 = vector.broadcast %28 : vector<8x1xf32> to vector<8x256xf32>
    %32 = arith.addf %30, %31 : vector<8x256xf32>
    %cst_18 = arith.constant 2.000000e-01 : f32
    %33 = vector.broadcast %cst_18 : f32 to vector<8x256xf32>
    %34 = arith.mulf %33, %32 : vector<8x256xf32>
    %35 = arith.maximumf %32, %34 : vector<8x256xf32>
    %c0_19 = arith.constant 0 : index
    %c0_20 = arith.constant 0 : index
    %36 = vector.load %arg3[%c0_19, %c0_20] : memref<8x8xf32, #tpu.memory_space<vmem>>, vector<8x8xf32>
    %cst_21 = arith.constant dense<0.000000e+00> : vector<8x256xf32>
    %37 = tpu.matmul %36, %35, %cst_21 {dimension_numbers = #tpu.dot_dimension_numbers<[1], [0], [0], [1], [0, 0, 1, 1], [], []>} : vector<8x8xf32>, vector<8x256xf32>, vector<8x256xf32> -> vector<8x256xf32>
    %c0_22 = arith.constant 0 : index
    %c0_23 = arith.constant 0 : index
    %38 = vector.load %arg6[%c0_22, %c0_23] : memref<8x8xf32, #tpu.memory_space<vmem>>, vector<8x8xf32>
    %c0_24 = arith.constant 0 : index
    %c0_25 = arith.constant 0 : index
    %c0_26 = arith.constant 0 : index
    %39 = vector.load %arg5[%c0_24, %c0_25, %c0_26] : memref<1x8x256xf32, #tpu.memory_space<vmem>>, vector<1x8x256xf32>
    %40 = vector.shape_cast %39 : vector<1x8x256xf32> to vector<8x256xf32>
    %cst_27 = arith.constant dense<0.000000e+00> : vector<8x256xf32>
    %41 = tpu.matmul %38, %40, %cst_27 {dimension_numbers = #tpu.dot_dimension_numbers<[1], [0], [0], [1], [0, 0, 1, 1], [], []>} : vector<8x8xf32>, vector<8x256xf32>, vector<8x256xf32> -> vector<8x256xf32>
    %42 = arith.addf %37, %41 : vector<8x256xf32>
    %cst_28 = arith.constant 2.000000e-01 : f32
    %43 = vector.broadcast %cst_28 : f32 to vector<8x256xf32>
    %44 = arith.mulf %43, %42 : vector<8x256xf32>
    %45 = arith.maximumf %42, %44 : vector<8x256xf32>
    %cst_29 = arith.constant dense<0.000000e+00> : vector<8xf32>
    %46 = vector.multi_reduction <add>, %45, %cst_29 [1] : vector<8x256xf32> to vector<8xf32>
    %47 = vector.shape_cast %46 : vector<8xf32> to vector<8x1xf32>
    %cst_30 = arith.constant 3.906250e-03 : f32
    %48 = vector.broadcast %cst_30 : f32 to vector<8x1xf32>
    %49 = arith.mulf %47, %48 : vector<8x1xf32>
    %50 = arith.mulf %45, %45 : vector<8x256xf32>
    %cst_31 = arith.constant dense<0.000000e+00> : vector<8xf32>
    %51 = vector.multi_reduction <add>, %50, %cst_31 [1] : vector<8x256xf32> to vector<8xf32>
    %52 = vector.shape_cast %51 : vector<8xf32> to vector<8x1xf32>
    %cst_32 = arith.constant 3.906250e-03 : f32
    %53 = vector.broadcast %cst_32 : f32 to vector<8x1xf32>
    %54 = arith.mulf %52, %53 : vector<8x1xf32>
    %55 = arith.mulf %49, %49 : vector<8x1xf32>
    %56 = arith.subf %54, %55 : vector<8x1xf32>
    %cst_33 = arith.constant 9.99999974E-6 : f32
    %57 = vector.broadcast %cst_33 : f32 to vector<8x1xf32>
    %58 = arith.addf %56, %57 : vector<8x1xf32>
    %59 = math.rsqrt %58 : vector<8x1xf32>
    %60 = arith.mulf %5, %59 : vector<8x1xf32>
    %61 = arith.mulf %49, %60 : vector<8x1xf32>
    %62 = arith.subf %7, %61 : vector<8x1xf32>
    %63 = vector.broadcast %60 : vector<8x1xf32> to vector<8x256xf32>
    %64 = arith.mulf %45, %63 : vector<8x256xf32>
    %65 = vector.broadcast %62 : vector<8x1xf32> to vector<8x256xf32>
    %66 = arith.addf %64, %65 : vector<8x256xf32>
    %c0_34 = arith.constant 0 : index
    %c0_35 = arith.constant 0 : index
    %c0_36 = arith.constant 0 : index
    %67 = vector.load %arg7[%c0_34, %c0_35, %c0_36] : memref<1x8x256xf32, #tpu.memory_space<vmem>>, vector<1x8x256xf32>
    %68 = vector.shape_cast %67 : vector<1x8x256xf32> to vector<8x256xf32>
    %69 = vector.shape_cast %66 : vector<8x256xf32> to vector<1x8x256xf32>
    tpu.vector_store %arg7[%c0_34, %c0_35, %c0_36], %69 {strides = array<i32>} : memref<1x8x256xf32, #tpu.memory_space<vmem>>, vector<1x8x256xf32>,
    return
  }
  func.func @transform_0(%arg0: i32) -> (i32, i32, i32) {
    %c0_i32 = arith.constant 0 : i32
    %c0_i32_0 = arith.constant 0 : i32
    %c0_i32_1 = arith.constant 0 : i32
    return %arg0, %c0_i32, %c0_i32_0 : i32, i32, i32
  }
  func.func @transform_1(%arg0: i32) -> (i32, i32) {
    %c0_i32 = arith.constant 0 : i32
    %c0_i32_0 = arith.constant 0 : i32
    %c0_i32_1 = arith.constant 0 : i32
    return %c0_i32, %c0_i32_0 : i32, i32
  }
  func.func @transform_2(%arg0: i32) -> (i32, i32) {
    %c0_i32 = arith.constant 0 : i32
    %c0_i32_0 = arith.constant 0 : i32
    %c0_i32_1 = arith.constant 0 : i32
    return %c0_i32, %c0_i32_0 : i32, i32
  }
  func.func @transform_3(%arg0: i32) -> (i32, i32, i32) {
    %c0_i32 = arith.constant 0 : i32
    %c0_i32_0 = arith.constant 0 : i32
    %c0_i32_1 = arith.constant 0 : i32
    %c0_i32_2 = arith.constant 0 : i32
    return %c0_i32, %c0_i32_0, %c0_i32_1 : i32, i32, i32
  }
  func.func @transform_4(%arg0: i32) -> (i32, i32, i32) {
    %c0_i32 = arith.constant 0 : i32
    %c0_i32_0 = arith.constant 0 : i32
    %c0_i32_1 = arith.constant 0 : i32
    return %arg0, %c0_i32, %c0_i32_0 : i32, i32, i32
  }
  func.func @transform_5(%arg0: i32) -> (i32, i32) {
    %c0_i32 = arith.constant 0 : i32
    %c0_i32_0 = arith.constant 0 : i32
    %c0_i32_1 = arith.constant 0 : i32
    return %c0_i32, %c0_i32_0 : i32, i32
  }
  func.func @transform_6(%arg0: i32) -> (i32, i32, i32) {
    %c0_i32 = arith.constant 0 : i32
    %c0_i32_0 = arith.constant 0 : i32
    %c0_i32_1 = arith.constant 0 : i32
    return %arg0, %c0_i32, %c0_i32_0 : i32, i32, i32
  }
}

</mosaic_0001>

<bundles_post_ra>
// kernel: tpu_custom_call.1
= control target key start
LH: loop header
LB: loop body
LE: loop exit
PB: predicated region body
PF: predicated region fallthrough
CT: control target
= control target key end

     0   :  { %11 = vsyncpa [#allocation3], 0  ;;  %s1453_s0 = inlined_call_operand.hbm [shape: f32[2,200,256], index: 0, kind: input, shape index: {}]   ;;  %s1454_s1 = inlined_call_operand.vmem [shape: f32[8,200], index: 1, kind: input, shape index: {}]   ;;  %s1455_s2 = inlined_call_operand.hbm [shape: f32[8,8], index: 2, kind: input, shape index: {}]   ;;  %s1456_s3 = inlined_call_operand.vmem [shape: f32[4,8,1], index: 3, kind: input, shape index: {}]   ;;  %s1457_s4 = inlined_call_operand.vmem [shape: f32[2,8,256], index: 4, kind: input, shape index: {}]   ;;  %s1458_s5 = inlined_call_operand.hbm [shape: f32[8,8], index: 5, kind: input, shape index: {}]   ;;  %s1459_s6 = inlined_call_operand.hbm [shape: f32[2,8,256], index: 6, kind: output, shape index: {}]  }
   0x1   :  { %13 = vsyncpa [#allocation3 + $0x1], 0 }
   0x2   :  { %14 = vsyncpa [#allocation6], 0 }
   0x3   :  { %15 = vsyncpa [#allocation4], 0 }
   0x4   :  { %17 = vsyncpa [#allocation4 + $0x1], 0  ;;  %s1146_s21 = smov 0   ;;  %s1148_s22 = smov 0  }
   0x5   :  { %s1150_s23 = smov 0   ;;  %s1152_s24 = smov 0  }
   0x6 LB: > { %s1167_s25 = sadd.s32 4294967295, %s1101_s24   ;;  %s790_s26 = sadd.s32 4294967294, %s1101_s24   ;;  %s1101_s24 = sphi %s1152_s24, %s1486_s24   ;;  %s1097_s23 = sphi %s1150_s23, %s1485_s23   ;;  %s1093_s22 = sphi %s1148_s22, %s1484_s22   ;;  %s1089_s21 = sphi %s1146_s21, %s1483_s21  }
   0x7   : > { %s1171_s27 = sadd.s32 1, %s1101_s24   ;;  %s30_s28 = sadd.s32 1, %s1097_s23 }
   0x8   : > { %s27_s29 = ssub.s32 %s1101_s24, %s1171_s27  ;;  %p37_p0 = scmp.ne.s32.totalorder %s1097_s23, %s1093_s22 }
   0x9   : > { %p28_p1 = scmp.eq.s32.totalorder %s27_s29, 0  ;;  %p38_p2 = scmp.eq.s32.totalorder %s1101_s24, 0 }
   0xa   : > { %p43_p3 = scmp.ne.s32.totalorder %s1093_s22, %s1089_s21  ;;  %p1460_p4 = scmp.eq.s32.totalorder %s1167_s25, 0 }
   0xb   : > { %s1183_s30 = scalar_select %p28_p1, %s1097_s23, %s30_s28  }
   0xc   : > { %p1185_p5 = por %p38_p2, %p37_p0  ;;  %p1191_p6 = por %p1460_p4, %p43_p3 }
   0xd   : > { %1465 = sst [smem:[#allocation12_spill]] %s1183_s30  ;;  %p177_p7 = scmp.eq.s32.totalorder %s1167_s25, 1 }
   0xe   : > { %s1467_s8 = scalar_select %p1191_p6, 1, 0 }
   0xf   : > { %p183_p8 = scmp.eq.s32.totalorder %s790_s26, 1  ;;  %p791_p9 = scmp.ge.s32.totalorder %s1101_s24, 1 }
  0x10   : > { %p190_p10 = scmp.lt.s32.totalorder %s1101_s24, 3  ;;  %p1198_p11 = por %p177_p7, %p37_p0 }
  0x11   : > { %p1202_p12 = por %p183_p8, %p43_p3  ;;  %s1103_s12 = smov [#allocation5]  }
  0x12   : > { %s1468_s9 = scalar_select %p1198_p11, 1, 0 }
  0x13   : > { %s1469_s10 = scalar_select %p1202_p12, 1, 0 }
  0x14   : > { %p1206_p13 = pnand %p791_p9, %p190_p10  ;;  %s206_s13 = sshll.u32 %s1103_s12, 4  ;;  %s207_s13 = int_to_ptr.vmem [resolvable:$true] %s206_s13 }
  0x15   : > { %p897_p4 = scmp.lt.s32.totalorder %s1101_s24, 2  ;;  %p1471_p0 = scmp.eq.s32.totalorder %s1167_s25, 0 }
  0x16   : > { %s1470_s11 = scalar_select %p1206_p13, 1, 0 }
  0x17   : > { %p880_p2 = pneg %p1206_p13  ;;  %p1222_p3 = pnand %p897_p4, %p1185_p5 }
  0x18   : > { %s1104_s16 = smov [#allocation7]   ;;  %s945_s20 = scalar_lea.hbm %s1455_s2, 128 }
  0x19   : > { %p1216_p7 = pnand %p880_p2, %p1471_p0  ;;  %s220_s17 = sshll.u32 %s1104_s16, 4  ;;  %s1226_s17 = int_to_ptr.vmem [resolvable:$true] %s220_s17 }
  0x1a   : > { %s1473_s15 = scalar_select %p1222_p3, 1, 0 }
  0x1b   : > { %p946_p8 = scmp.ne.s32.totalorder %s1455_s2, %s945_s20  ;;  %p947_p9 = pneg %p1216_p7 }
  0x1c   : > { %p952_p10 = scmp.lt.u32.totalorder %s945_s20, %s1455_s2 }
  0x1d   : > { %p948_p4 = pnand %p947_p9, %p946_p8 }
  0x1f   : > { %p949_p5 = pneg %p948_p4 }
  0x21   : > { %p954_p2 = pnand %p952_p10, %p949_p5 }
  0x23   : > { %957 = shalt.err (!%p954_p2)
}
  0x24   : > { %s958_s12 = scalar_lea.vmem %s207_s13, 128  ;;  %p966_p11 = scmp.lt.s32.totalorder %s207_s13, %s207_s13 }
  0x25   : > { %p959_p0 = scmp.ne.s32.totalorder %s207_s13, %s958_s12  ;;  %p967_p6 = scmp.lt.s32.totalorder %s958_s12, %s958_s12 }
  0x27   : > { %p961_p1 = pnand %p959_p0, %p947_p9  ;;  %p968_p13 = por %p967_p6, %p966_p11 }
  0x29   : > { %p962_p12 = pneg %p961_p1 }
  0x2b   : > { %p969_p3 = pnand %p968_p13, %p962_p12 }
  0x2d   : > { %972 = shalt.err (!%p969_p3)
}
  0x2e   : > { %883 = dma.hbm_to_vmem [thread:$0]  (!%p1216_p7), %s1455_s2, 128, %s207_s13, [#allocation6]  }
  0x2f   : > { %s231_s19 = sand.u32 1, %s1097_s23   ;;  %s973_s28 = scalar_lea.hbm %s1458_s5, 128 }
  0x30   : > { %p974_p1 = scmp.ne.s32.totalorder %s1458_s5, %s973_s28  ;;  %p980_p12 = scmp.lt.u32.totalorder %s973_s28, %s1458_s5 }
  0x32   : > { %p976_p6 = pnand %p974_p1, %p947_p9 }
  0x34   : > { %p977_p11 = pneg %p976_p6 }
  0x36   : > { %p982_p13 = pnand %p980_p12, %p977_p11 }
  0x38   : > { %985 = shalt.err (!%p982_p13)
}
  0x39   : > { %s986_s13 = scalar_lea.vmem %s1226_s17, 128  ;;  %p994_p5 = scmp.lt.s32.totalorder %s1226_s17, %s1226_s17 }
  0x3a   : > { %p987_p3 = scmp.ne.s32.totalorder %s1226_s17, %s986_s13  ;;  %p995_p10 = scmp.lt.s32.totalorder %s986_s13, %s986_s13 }
  0x3c   : > { %p989_p8 = pnand %p987_p3, %p947_p9  ;;  %p996_p2 = por %p995_p10, %p994_p5 }
  0x3e   : > { %p990_p4 = pneg %p989_p8 }
  0x40   : > { %p997_p0 = pnand %p996_p2, %p990_p4 }
  0x42   : > { %1000 = shalt.err (!%p997_p0)
}
  0x43   : > { %886 = dma.hbm_to_vmem [thread:$0]  (!%p1216_p7), %s1458_s5, 128, %s1226_s17, [#allocation6]  }
  0x44   : > { %s865_s18 = smul.u32 400, %s231_s19  ;;  %s1284_s12 = scalar_lea.sflag [#allocation3], %s231_s19 }
  0x45   : > { %s866_s20 = smul.u32 6400, %s1101_s24  ;;  %p1474_p7 = scmp.ne.s32.totalorder %s1473_s15, 0 }
  0x46   : > { %s235_s14 = scalar_lea.vmem [#allocation2], %s865_s18  ;;  %s1006_s16 = scalar_lea.hbm %s1453_s0, 12800 }
  0x47   : > { %s1280_s29 = scalar_lea.hbm %s1453_s0, %s866_s20  ;;  %s242_s7 = sshll.u32 %s235_s14, 4  ;;  %s1282_s7 = int_to_ptr.vmem [resolvable:$true] %s242_s7 }
  0x48   : > { %s1001_s13 = scalar_lea.hbm %s1280_s29, 6400  ;;  %p1003_p1 = pneg %p1474_p7 }
  0x49   : > { %p1002_p9 = scmp.ne.s32.totalorder %s1280_s29, %s1001_s13  ;;  %p1007_p12 = scmp.lt.u32.totalorder %s1280_s29, %s1453_s0 }
  0x4a   : > { %p1008_p13 = scmp.lt.u32.totalorder %s1006_s16, %s1001_s13  ;;  %p1010_p8 = scmp.lt.u32.totalorder %s1001_s13, %s1280_s29 }
  0x4b   : > { %p1004_p6 = pnand %p1003_p1, %p1002_p9 }
  0x4c   : > { %p1009_p3 = por %p1008_p13, %p1007_p12 }
  0x4d   : > { %p1005_p11 = pneg %p1004_p6 }
  0x4e   : > { %p1011_p4 = por %p1010_p8, %p1009_p3 }
  0x50   : > { %p1012_p5 = pnand %p1011_p4, %p1005_p11 }
  0x52   : > { %1015 = shalt.err (!%p1012_p5)
}
  0x53   : > { %s1016_s19 = scalar_lea.vmem %s1282_s7, 6400  ;;  %s1105_s18 = smov [#allocation2]  }
  0x54   : > { %p1017_p10 = scmp.ne.s32.totalorder %s1282_s7, %s1016_s19  ;;  %s1021_s28 = sshll.u32 %s1105_s18, 4  ;;  %s1022_s28 = int_to_ptr.vmem [resolvable:$false] %s1021_s28 }
  0x55   : > { %s1023_s14 = scalar_lea.vmem %s1022_s28, 12800  ;;  %p1024_p9 = scmp.lt.s32.totalorder %s1282_s7, %s1022_s28 }
  0x56   : > { %p1019_p2 = pnand %p1017_p10, %p1003_p1  ;;  %p1025_p6 = scmp.lt.s32.totalorder %s1023_s14, %s1016_s19 }
  0x58   : > { %p1020_p0 = pneg %p1019_p2  ;;  %p1026_p12 = por %p1025_p6, %p1024_p9 }
  0x5a   : > { %p1027_p13 = pnand %p1026_p12, %p1020_p0 }
  0x5c   : > { %1030 = shalt.err (!%p1027_p13)
}
  0x5d   : > { %s1106_s13 = smov 256   ;;  %s1107_s17 = smov 16  }
  0x5e   : > { %890 = dma.hbm_to_vmem [thread:$0]  (!%p1474_p7), %s1280_s29, 6400, %s1282_s7, %s1284_s12, %s1106_s13, %s1106_s13, %s1107_s17  }
  0x5f   : > { %p1475_p1 = scmp.ne.s32.totalorder %s1470_s11, 0 }
  0x60   : > { %s1315_s30 = sand.u32 (!%p1475_p1), 1, %s1093_s22   ;;  %p1476_p11 = scmp.ne.s32.totalorder (!%p1475_p1), %s1467_s8, 0 }
  0x61   : > { %262 = sbr.rel (%p1475_p1) target bundleno = 1211 (0x4bb), region = 44  ;;  %s265_s20 = scalar_lea.sflag (!%p1475_p1), [#allocation3], %s1315_s30 }
  0x62   : > { %s867_s16 = smul.u32 (!%p1475_p1), 400, %s1315_s30 }
  0x64   : > { %s1319_s26 = scalar_lea.vmem (!%p1475_p1), [#allocation2], %s867_s16 }
  0x68   : > { %1076 = dma.done.wait (%p1476_p11), %s265_s20, 6400  }
  0x69   : > { %1078 = vsyncadd (%p1476_p11), %s265_s20, 4294960896  ;;  %p1477_p7 = scmp.eq.s32.totalorder %s1167_s25, 0 }
  0x6b   : > { %1080 = dma.done.wait (%p1477_p7), [#allocation6], 256   ;;  %p1478_p3 = pmov %p1477_p7 }
  0x6c   : > { %v325_v0 = vld [vmem:[%s1319_s26 + $0x8] sm:$0xff]  ;;  %v327_v1 = vld [vmem:[%s1319_s26 + $0x18] sm:$0xff]  ;;  %v324_v2 = vld [vmem:[%s1319_s26] sm:$0xff]  ;;  %vm374_vm0 = vcmask 588800   ;;  %p310_p8 = scmp.lt.s32.totalorder %s1167_s25, 1  ;;  %vm488_vm1 = vcmask 64512  }
  0x6d   : > { %1082 = vsyncadd (%p1478_p3), [#allocation6], 4294967040  ;;  %v815_v3 = vpack.c.bf16 %v327_v1, %v325_v0  ;;  %v326_v4 = vld [vmem:[%s1319_s26 + $0x10] sm:$0xff]  ;;  %v329_v5 = vld [vmem:[%s1319_s26 + $0x28] sm:$0xff]  ;;  %s799_s15 = sshll.u32 %s1315_s30, 4  ;;  %s814_s29 = sshll.u32 %s1167_s25, 8 }
  0x6e   : > { %v331_v6 = vld [vmem:[%s1319_s26 + $0x38] sm:$0xff]  ;;  %v817_v7 = vpack.c.bf16 %v326_v4, %v324_v2  ;;  %v328_v9 = vld [vmem:[%s1319_s26 + $0x20] sm:$0xff]  ;;  %v330_v10 = vld [vmem:[%s1319_s26 + $0x30] sm:$0xff]  ;;  %s311_s19 = scalar_select %p310_p8, %s1167_s25, 1 }
  0x6f   : > { %v819_v8 = vpack.c.bf16 %v331_v6, %v329_v5  ;;  %v333_v11 = vld [vmem:[%s1319_s26 + $0x48] sm:$0xff]  ;;  %816 = vmatprep.subr.bf16.mxu0 %v815_v3  ;;  %v335_v12 = vld [vmem:[%s1319_s26 + $0x58] sm:$0xff]  ;;  %v821_v13 = vpack.c.bf16 %v330_v10, %v328_v9  ;;  %v332_v15 = vld [vmem:[%s1319_s26 + $0x40] sm:$0xff]  ;;  %s309_s7 = scalar_lea.vmem [#allocation8], %s799_s15  ;;  %s1409_s28 = scalar_lea.hbm %s1459_s6, %s814_s29 }
  0x70   : > { %818 = vmatpush1.bf16.msra.mxu0 %v817_v7  ;;  %v823_v14 = vpack.c.bf16 %v335_v12, %v333_v11  ;;  %v334_v16 = vld [vmem:[%s1319_s26 + $0x50] sm:$0xff]  ;;  %v337_v17 = vld [vmem:[%s1319_s26 + $0x68] sm:$0xff]  ;;  %v339_v18 = vld [vmem:[%s1319_s26 + $0x78] sm:$0xff]  ;;  %s813_s14 = sshll.u32 %s311_s19, 4  ;;  %s689_s12 = sshll.u32 %s309_s7, 4  ;;  %s1411_s12 = int_to_ptr.vmem [resolvable:$true] %s689_s12 }
  0x71   : > { %820 = vmatprep.subr.bf16.mxu0 %v819_v8  ;;  %v825_v19 = vpack.c.bf16 %v334_v16, %v332_v15  ;;  %v827_v20 = vpack.c.bf16 %v339_v18, %v337_v17  ;;  %v336_v21 = vld [vmem:[%s1319_s26 + $0x60] sm:$0xff]  ;;  %v338_v22 = vld [vmem:[%s1319_s26 + $0x70] sm:$0xff]  ;;  %v341_v23 = vld [vmem:[%s1319_s26 + $0x88] sm:$0xff]  ;;  %v1108_v18 = vmov 0   ;;  %s314_s16 = scalar_lea.vmem %s1457_s4, %s813_s14  ;;  %s675_s25 = scalar_lea.sflag [#allocation4], %s1315_s30 }
  0x72   : > { %v343_v24 = vld [vmem:[%s1319_s26 + $0x98] sm:$0xff]  ;;  %v829_v25 = vpack.c.bf16 %v338_v22, %v336_v21  ;;  %v340_v27 = vld [vmem:[%s1319_s26 + $0x80] sm:$0xff]  ;;  %v342_v28 = vld [vmem:[%s1319_s26 + $0x90] sm:$0xff]  ;;  %939 = vset.pattern.permute.xlu1 %v1108_v18  ;;  %940 = vset.pattern.permute.xlu0 %v1108_v18  ;;  %s1031_s14 = scalar_lea.vmem %s1411_s12, 256  ;;  %p1479_p5 = scmp.ne.s32.totalorder %s1468_s9, 0 }
  0x73   : > { %v831_v26 = vpack.c.bf16 %v343_v24, %v341_v23  ;;  %v345_v29 = vld [vmem:[%s1319_s26 + $0xa8] sm:$0xff]  ;;  %v347_v30 = vld [vmem:[%s1319_s26 + $0xb8] sm:$0xff]  ;;  %v833_v31 = vpack.c.bf16 %v342_v28, %v340_v27  ;;  %v344_v34 = vld [vmem:[%s1319_s26 + $0xa0] sm:$0xff]  ;;  %p1032_p4 = scmp.ne.s32.totalorder %s1411_s12, %s1031_s14  ;;  %s1110_s13 = smov [#allocation8]  }
  0x74   : > { %822 = vmatpush1.bf16.msra.mxu0 %v821_v13  ;;  %v323_v32 = vld [vmem:[%s1454_s1 + $0x8] sm:$0xff]  ;;  %v835_v33 = vpack.c.bf16 %v347_v30, %v345_v29  ;;  %v346_v35 = vld [vmem:[%s1319_s26 + $0xb0] sm:$0xff]  ;;  %v348_v40 = vld [vmem:[%s1319_s26 + $0xc0] sm:$0xff]  ;;  %s1035_s17 = sshll.u32 %s1110_s13, 4  ;;  %s1036_s17 = int_to_ptr.vmem [resolvable:$false] %s1035_s17 }
  0x75   : > { %824 = vmatprep.subr.bf16.mxu0 %v823_v14  ;;  %805 = vmatprep.mubr.msk.f32.mxu0 %vm374_vm0, %v323_v32  ;;  %v349_v36 = vld [vmem:[%s1319_s26 + $0xc8] sm:$0xff]  ;;  %v351_v37 = vld [vmem:[%s1319_s26 + $0xd8] sm:$0xff]  ;;  %v837_v38 = vpack.c.bf16 %v346_v35, %v344_v34  ;;  %v350_v41 = vld [vmem:[%s1319_s26 + $0xd0] sm:$0xff]  ;;  %p1033_p10 = pnand %p1032_p4, %p1479_p5  ;;  %p1038_p0 = scmp.lt.s32.totalorder %s1411_s12, %s1036_s17 }
  0x76   : > { %v839_v39 = vpack.c.bf16 %v351_v37, %v349_v36  ;;  %v353_v42 = vld [vmem:[%s1319_s26 + $0xe8] sm:$0xff]  ;;  %v355_v43 = vld [vmem:[%s1319_s26 + $0xf8] sm:$0xff]  ;;  %v841_v44 = vpack.c.bf16 %v350_v41, %v348_v40  ;;  %v352_v46 = vld [vmem:[%s1319_s26 + $0xe0] sm:$0xff] }
  0x77   : > { %v843_v45 = vpack.c.bf16 %v355_v43, %v353_v42  ;;  %v354_v47 = vld [vmem:[%s1319_s26 + $0xf0] sm:$0xff]  ;;  %v357_v48 = vld [vmem:[%s1319_s26 + $0x108] sm:$0xff]  ;;  %v359_v49 = vld [vmem:[%s1319_s26 + $0x118] sm:$0xff]  ;;  %p1034_p2 = pneg %p1033_p10 }
  0x78   : > { %826 = vmatpush1.bf16.msra.mxu0 %v825_v19  ;;  %v845_v50 = vpack.c.bf16 %v354_v47, %v352_v46  ;;  %v847_v51 = vpack.c.bf16 %v359_v49, %v357_v48  ;;  %v356_v52 = vld [vmem:[%s1319_s26 + $0x100] sm:$0xff]  ;;  %v358_v53 = vld [vmem:[%s1319_s26 + $0x110] sm:$0xff]  ;;  %v361_v54 = vld [vmem:[%s1319_s26 + $0x128] sm:$0xff] }
  0x79   : > { %828 = vmatprep.subr.bf16.mxu0 %v827_v20  ;;  %v363_v55 = vld [vmem:[%s1319_s26 + $0x138] sm:$0xff]  ;;  %v849_v56 = vpack.c.bf16 %v358_v53, %v356_v52  ;;  %v360_v58 = vld [vmem:[%s1319_s26 + $0x120] sm:$0xff]  ;;  %v362_v59 = vld [vmem:[%s1319_s26 + $0x130] sm:$0xff] }
  0x7a   : > { %v851_v57 = vpack.c.bf16 %v363_v55, %v361_v54  ;;  %v365_v60 = vld [vmem:[%s1319_s26 + $0x148] sm:$0xff]  ;;  %v367_v61 = vld [vmem:[%s1319_s26 + $0x158] sm:$0xff]  ;;  %v853_v62 = vpack.c.bf16 %v362_v59, %v360_v58  ;;  %v364_v0 = vld [vmem:[%s1319_s26 + $0x140] sm:$0xff] }
  0x7b   : > { %v855_v63 = vpack.c.bf16 %v367_v61, %v365_v60  ;;  %v366_v1 = vld [vmem:[%s1319_s26 + $0x150] sm:$0xff]  ;;  %v369_v2 = vld [vmem:[%s1319_s26 + $0x168] sm:$0xff]  ;;  %v371_v3 = vld [vmem:[%s1319_s26 + $0x178] sm:$0xff] }
  0x7c   : > { %830 = vmatpush1.bf16.msra.mxu0 %v829_v25  ;;  %v857_v4 = vpack.c.bf16 %v366_v1, %v364_v0  ;;  %v859_v5 = vpack.c.bf16 %v371_v3, %v369_v2  ;;  %v368_v6 = vld [vmem:[%s1319_s26 + $0x160] sm:$0xff]  ;;  %v370_v7 = vld [vmem:[%s1319_s26 + $0x170] sm:$0xff]  ;;  %v373_v9 = vld [vmem:[%s1319_s26 + $0x188] sm:$0xff] }
  0x7d   : > { %832 = vmatprep.subr.bf16.mxu0 %v831_v26  ;;  %v861_v8 = vpack.c.bf16 %v370_v7, %v368_v6  ;;  %v372_v10 = vld [vmem:[%s1319_s26 + $0x180] sm:$0xff]  ;;  %v802_v29 = vld [vmem:[%s1456_s3 + $0x8] sm:$0xff]  ;;  %v804_v3 = vld [vmem:[%s1456_s3 + $0x18] sm:$0xff] }
  0x7e   : > { %v322_v11 = vld [vmem:[%s1454_s1] sm:$0xff]  ;;  %v485_v35 = vld [vmem:[#allocation7] sm:$0xff]  ;;  %v803_v0 = vld [vmem:[%s1456_s3 + $0x10] sm:$0xff] }
  0x7f   : > { %v315_v26 = vld [vmem:[%s1456_s3] sm:$0xff] }
  0x80   : > { %834 = vmatpush1.bf16.msra.mxu0 %v833_v31  ;;  %v487_v31 = vld [vmem:[%s314_s16 + $0x8] sm:$0xff]  ;;  %v486_v32 = vld [vmem:[%s314_s16] sm:$0xff]  ;;  %s1037_s16 = scalar_lea.vmem %s1036_s17, 512 }
  0x81   : > { %836 = vmatprep.subr.bf16.mxu0 %v835_v33  ;;  %v1109_v33 = vmov 0.0   ;;  %492 = vmatprep.subr.mxu1 %v487_v31  ;;  %v484_v46 = vld [vmem:[#allocation5] sm:$0xff]  ;;  %p1039_p9 = scmp.lt.s32.totalorder %s1037_s16, %s1031_s14 }
  0x82   : > { %556 = vmatprep.mubr.f32.mxu1 %v1109_v33  ;;  %493 = vmatpush1.msra.mxu1 %v486_v32 }
  0x83   : > { %806 = vmatmul.mubr.msk.f32.vlgmr.msra.gmra.mrb[0].mxu1 %vm488_vm1, %v485_v35  ;;  %p1040_p6 = por %p1039_p9, %p1038_p0 }
  0x84   : > { %838 = vmatpush1.bf16.msra.mxu0 %v837_v38  ;;  %630 = vmatprep.mubr.f32.mxu1 %v1109_v33 }
  0x85   : > { %840 = vmatprep.subr.bf16.mxu0 %v839_v39  ;;  %p1041_p12 = pnand %p1040_p6, %p1034_p2 }
  0x88   : > { %842 = vmatpush1.bf16.msra.mxu0 %v841_v44 }
  0x89   : > { %844 = vmatprep.subr.bf16.mxu0 %v843_v45 }
  0x8c   : > { %846 = vmatpush1.bf16.msra.mxu0 %v845_v50 }
  0x8d   : > { %848 = vmatprep.subr.bf16.mxu0 %v847_v51 }
  0x90   : > { %850 = vmatpush1.bf16.msra.mxu0 %v849_v56 }
  0x91   : > { %852 = vmatprep.subr.bf16.mxu0 %v851_v57 }
  0x94   : > { %854 = vmatpush1.bf16.msra.mxu0 %v853_v62 }
  0x95   : > { %856 = vmatprep.subr.bf16.mxu0 %v855_v63 }
  0x98   : > { %858 = vmatpush1.bf16.msra.mxu0 %v857_v4 }
  0x99   : > { %860 = vmatprep.subr.bf16.mxu0 %v859_v5 }
  0x9c   : > { %862 = vmatpush1.bf16.msra.mxu0 %v861_v8 }
  0x9d   : > { %426 = vmatprep.subr.mxu0 %v373_v9 }
  0xa0   : > { %427 = vmatpush1.msra.mxu0 %v372_v10 }
  0xa1   : > { %443 = vmatmul.mubr.f32.vlgmr.msra.gmra.mrb[0].mxu0 %v322_v11 }
 0x174   : > { %v444_v12 = vpop.f32.mrb[0].mxu0 }
 0x175   : > { %v446_v13 = vpop.f32.mrb[1].mxu0  ;;  %v453_v14 = vmul.f32 %v444_v12, %v444_v12 }
 0x176   : > { %v454_v15 = vmul.f32 %v446_v13, %v446_v13  ;;  %v449_v16 = vadd.f32 %v446_v13, %v444_v12 }
 0x178   : > { %450 = vadd.xlane.f32.xlu0 %v449_v16  ;;  %v455_v17 = vadd.f32 %v454_v15, %v453_v14 }
 0x17c   : > { %456 = vadd.xlane.f32.xlu0 %v455_v17 }
 0x205   : > { %v451_v19 = vpop.xlane.xlu0 %450 }
 0x206   : > { %v452_v20 = vmul.f32 0.00390625, %v451_v19 }
 0x208   : > { %v459_v22 = vmul.f32 %v452_v20, %v452_v20 }
 0x209   : > { %v457_v21 = vpop.xlane.xlu0 %456 }
 0x20a   : > { %v458_v23 = vmul.f32 0.00390625, %v457_v21 }
 0x20c   : > { %v460_v24 = vsub.f32 %v458_v23, %v459_v22 }
 0x20e   : > { %v461_v25 = vadd.f32 1e-05, %v460_v24 }
 0x210   : > { %941 = vrsqrt.f32 %v461_v25 }
 0x21a   : > { %v942_v27 = vpop.eup %941 }
 0x21b   : > { %v463_v28 = vmul.f32 %v942_v27, %v315_v26 }
 0x21d   : > { %468 = vperm.xlu1 %939, %v463_v28   ;;  %v464_v30 = vmul.f32 %v463_v28, %v452_v20 }
 0x21f   : > { %v465_v34 = vsub.f32 %v802_v29, %v464_v30 }
 0x221   : > { %475 = vperm.xlu1 %939, %v465_v34  }
 0x29c   : > { %v469_v36 = vpop.permute.xlu1 %468 }
 0x29d   : > { %v471_v37 = vmul.f32 %v469_v36, %v444_v12  ;;  %v472_v38 = vmul.f32 %v469_v36, %v446_v13 }
 0x2a0   : > { %v476_v39 = vpop.permute.xlu1 %475 }
 0x2a1   : > { %v478_v40 = vadd.f32 %v476_v39, %v471_v37  ;;  %v479_v41 = vadd.f32 %v476_v39, %v472_v38 }
 0x2a3   : > { %v480_v42 = vmul.f32 0.2, %v478_v40  ;;  %v481_v43 = vmul.f32 0.2, %v479_v41 }
 0x2a5   : > { %v482_v44 = vmax.f32 %v478_v40, %v480_v42  ;;  %v483_v45 = vmax.f32 %v479_v41, %v481_v43 }
 0x2a7   : > { %566 = vmatprep.subr.mxu1 %v483_v45 }
 0x2a8   : > { %567 = vmatpush1.msra.mxu1 %v482_v44 }
 0x2a9   : > { %807 = vmatmul.mubr.msk.f32.vlgmr.msra.gmra.mrb[0].mxu1 %vm488_vm1, %v484_v46 }
 0x37c   : > { %v632_v47 = vpop.f32.mrb[0].mxu1 }
 0x37d   : > { %v637_v48 = vmul.f32 0.2, %v632_v47  ;;  %v634_v49 = vpop.f32.mrb[1].mxu1 }
 0x37e   : > { %v638_v50 = vmul.f32 0.2, %v634_v49 }
 0x37f   : > { %v639_v51 = vmax.f32 %v632_v47, %v637_v48 }
 0x380   : > { %v640_v52 = vmax.f32 %v634_v49, %v638_v50 }
 0x381   : > { %v645_v53 = vmul.f32 %v639_v51, %v639_v51 }
 0x382   : > { %v641_v54 = vadd.f32 %v640_v52, %v639_v51  ;;  %v646_v55 = vmul.f32 %v640_v52, %v640_v52 }
 0x384   : > { %642 = vadd.xlane.f32.xlu0 %v641_v54  ;;  %v647_v56 = vadd.f32 %v646_v55, %v645_v53 }
 0x386   : > { %648 = vadd.xlane.f32.xlu1 %v647_v56 }
 0x411   : > { %v643_v57 = vpop.xlane.xlu0 %642 }
 0x412   : > { %v644_v58 = vmul.f32 0.00390625, %v643_v57 }
 0x413   : > { %v649_v59 = vpop.xlane.xlu1 %648 }
 0x414   : > { %v651_v60 = vmul.f32 %v644_v58, %v644_v58  ;;  %v650_v61 = vmul.f32 0.00390625, %v649_v59 }
 0x416   : > { %v652_v62 = vsub.f32 %v650_v61, %v651_v60 }
 0x418   : > { %v653_v63 = vadd.f32 1e-05, %v652_v62 }
 0x41a   : > { %943 = vrsqrt.f32 %v653_v63 }
 0x424   : > { %v944_v1 = vpop.eup %943 }
 0x425   : > { %v655_v2 = vmul.f32 %v944_v1, %v803_v0 }
 0x427   : > { %660 = vperm.xlu0 %940, %v655_v2   ;;  %v656_v4 = vmul.f32 %v655_v2, %v644_v58 }
 0x429   : > { %v657_v5 = vsub.f32 %v804_v3, %v656_v4 }
 0x42b   : > { %667 = vperm.xlu1 %939, %v657_v5  }
 0x4a6   : > { %v661_v6 = vpop.permute.xlu0 %660 }
 0x4a7   : > { %v663_v7 = vmul.f32 %v661_v6, %v639_v51  ;;  %v664_v8 = vmul.f32 %v661_v6, %v640_v52 }
 0x4aa   : > { %v668_v9 = vpop.permute.xlu1 %667 }
 0x4ab   : > { %v670_v10 = vadd.f32 %v668_v9, %v663_v7  ;;  %v671_v11 = vadd.f32 %v668_v9, %v664_v8 }
 0x4ad   : > { %672 = vst [vmem:[%s309_s7] sm:$0xff] %v670_v10  ;;  %673 = vst [vmem:[%s309_s7 + $0x8] sm:$0xff] %v671_v11 }
 0x4ae   : > { %1044 = shalt.err (!%p1041_p12)
}
 0x4af   : > { %s1045_s30 = scalar_lea.hbm %s1409_s28, 256  ;;  %s1049_s8 = scalar_lea.hbm %s1459_s6, 512 }
 0x4b0   : > { %p1046_p13 = scmp.ne.s32.totalorder %s1409_s28, %s1045_s30  ;;  %p1050_p7 = scmp.lt.u32.totalorder %s1409_s28, %s1459_s6 }
 0x4b1   : > { %p1051_p3 = scmp.lt.u32.totalorder %s1049_s8, %s1045_s30  ;;  %p1053_p4 = scmp.lt.u32.totalorder %s1045_s30, %s1409_s28 }
 0x4b2   : > { %p1047_p1 = pnand %p1046_p13, %p1479_p5 }
 0x4b3   : > { %p1052_p8 = por %p1051_p3, %p1050_p7 }
 0x4b4   : > { %p1048_p11 = pneg %p1047_p1 }
 0x4b5   : > { %p1054_p10 = por %p1053_p4, %p1052_p8 }
 0x4b7   : > { %p1055_p2 = pnand %p1054_p10, %p1048_p11 }
 0x4b9   : > { %1058 = shalt.err (!%p1055_p2)
}
 0x4ba   : > { %878 = dma.vmem_to_hbm [thread:$0]  (%p1479_p5), %s1411_s12, 256, %s1409_s28, %s675_s25  }
 0x4bb PF: > { %s701_s29 = sand.u32 1, %s1089_s21   ;;  %p1480_p0 = scmp.ne.s32.totalorder %s1469_s10, 0 }
 0x4bc   : > { %p1481_p9 = scmp.ge.s32.totalorder %s1101_s24, 2  ;;  %s702_s7 = scalar_lea.sflag [#allocation4], %s701_s29 }
 0x4be   : > { %p892_p6 = pnand %p1481_p9, %p1480_p0 }
 0x4c0   : > { %1084 = dma.done.wait (!%p892_p6), %s702_s7, 256  }
 0x4c1   : > { %1086 = vsyncadd (!%p892_p6), %s702_s7, 4294967040  ;;  %s1482_s19 = sld [smem:[#allocation12_spill]]  ;;  %p20_p12 = scmp.ge.s32.totalorder %s1171_s27, 4  }
 0x4c2   : > { %s1483_s21 = smov %s1093_s22  ;;  %s1484_s22 = smov %s1097_s23 }
 0x4c3   : > { %s1486_s24 = smov %s1171_s27  ;;  %22 = sbr.rel (!%p20_p12) target bundleno = 6 (0x6), region = 103 }
 0x4c7   : > { %s1485_s23 = smov %s1482_s19 }
 0x4ca   :  { %707 = vsyncpa [#allocation3], 1 }
 0x4cb   :  { %709 = vsyncpa [#allocation3 + $0x1], 1 }
 0x4cc   :  { %710 = vsyncpa [#allocation6], 1 }
 0x4cd   :  { %711 = vsyncpa [#allocation4], 1 }
 0x4ce   :  { %713 = vsyncpa [#allocation4 + $0x1], 1 }

</bundles_post_ra>
